<compile_context>
chip_gen: v7x
topology: tpu7x:2x2x1
jax: 0.10.0
libtpu: 0.0.40
codegen_flags: <defaults>
</compile_context>

<pallas_src>
import jax
import jax.numpy as jnp
from jax.experimental import pallas as pl
from jax.experimental.pallas import tpu as pltpu

_LANES = 128
_SUBLANES = 8
_ALIGN = _SUBLANES * _LANES  # 1024-element alignment for the flat slab


def _affine_kernel(params_ref, x_ref, o_ref):
    # params_ref: SMEM (2,) f32 -> [w_eff, b_eff]
    # x_ref / o_ref: VMEM (block_rows, 128) f32 tiles
    w = params_ref[0]
    b = params_ref[1]
    o_ref[...] = (x_ref[...] * w + b).astype(o_ref.dtype)


def _fold_params(w1, b1, w2, b2):
    w1s = w1.reshape(()).astype(jnp.float32)
    w2s = w2.reshape(()).astype(jnp.float32)
    b1s = b1.reshape(()).astype(jnp.float32)
    b2s = b2.reshape(()).astype(jnp.float32)
    w_eff = w1s * w2s
    b_eff = b1s * w2s + b2s
    return w_eff, b_eff


def _choose_block_rows(rows, requested):
    """Pick a sublane-aligned block height; keep >=2 grid steps when possible."""
    br = min(requested, rows)
    br = max(_SUBLANES, (br // _SUBLANES) * _SUBLANES)
    # Ensure at least 2 grid steps so the "parallel" grid axis can be sharded
    # across both TensorCores on v7x (a grid of 1 forfeits half the bandwidth).
    if rows >= 2 * _SUBLANES and br > rows // 2:
        half = ((rows // 2) // _SUBLANES) * _SUBLANES
        br = max(_SUBLANES, half)
    return br


def toy_model_forward(x, w1, b1, w2, b2, *, block_rows=4096,
                      fast_path_max_elems=1024):
    """x: (B, 1) float32.  w1, w2: (1, 1).  b1, b2: (1,)."""
    B, F = x.shape
    assert F == 1

    w_eff, b_eff = _fold_params(w1, b1, w2, b2)

    # Small-batch fast path: launch / pad / reshape overhead would dwarf the
    # nanoseconds of actual work; XLA fuses this into one elementwise op.
    if B <= fast_path_max_elems:
        return (x.astype(jnp.float32) * w_eff + b_eff).astype(jnp.float32)

    params = jnp.stack([w_eff, b_eff])  # (2,) f32 -> SMEM

    # Lane-dense slab: pad the flat batch only to a multiple of 8*128 elements
    # (sublane x lane), never to a whole number of grid blocks.
    flat = x.reshape(-1).astype(jnp.float32)
    n_pad = (-B) % _ALIGN
    flat_p = jnp.pad(flat, (0, n_pad)) if n_pad else flat
    rows = flat_p.shape[0] // _LANES          # multiple of 8
    x2d = flat_p.reshape(rows, _LANES)

    br = _choose_block_rows(rows, block_rows)
    grid = (pl.cdiv(rows, br),)               # ragged last block is masked by Pallas

    out2d = pl.pallas_call(
        _affine_kernel,
        out_shape=jax.ShapeDtypeStruct((rows, _LANES), jnp.float32),
        grid_spec=pl.GridSpec(
            grid=grid,
            in_specs=[
                # Folded scalar params: whole (2,) array in SMEM, no tiling.
                pl.BlockSpec(memory_space=pltpu.MemorySpace.SMEM),
                # Lane-dense input tile, double-buffered by the pipeline.
                pl.BlockSpec((br, _LANES), lambda i: (i, 0)),
            ],
            out_specs=pl.BlockSpec((br, _LANES), lambda i: (i, 0)),
        ),
        compiler_params=pltpu.CompilerParams(
            dimension_semantics=("parallel",),
        ),
    )(params, x2d)

    # Drop padded tail; restore (B, 1) layout.
    return out2d.reshape(-1)[:B].reshape(B, 1)


if __name__ == "__main__":
    key = jax.random.PRNGKey(0)
    k_x1, k_x2, k_w1, k_b1, k_w2, k_b2 = jax.random.split(key, 6)

    # Deterministic param init mimicking PyTorch Linear default:
    # uniform(-1/sqrt(fan_in), 1/sqrt(fan_in)) with fan_in = 1 -> U(-1, 1).
    w1 = jax.random.uniform(k_w1, (1, 1), jnp.float32, -1.0, 1.0)
    b1 = jax.random.uniform(k_b1, (1,),   jnp.float32, -1.0, 1.0)
    w2 = jax.random.uniform(k_w2, (1, 1), jnp.float32, -1.0, 1.0)
    b2 = jax.random.uniform(k_b2, (1,),   jnp.float32, -1.0, 1.0)

    def ref_fn(x):
        return (x @ w1.T + b1) @ w2.T + b2

    # 1) Tiny batch (B=8, matches the original demo) -> fused jnp fast path.
    B_small = 8
    x_small = jax.random.normal(k_x1, (B_small, 1), dtype=jnp.float32)
    out_small = jax.block_until_ready(toy_model_forward(x_small, w1, b1, w2, b2))
    assert out_small.shape == (B_small, 1)
    assert jnp.allclose(out_small, ref_fn(x_small), atol=1e-5, rtol=1e-5), \
        "fast-path mismatch vs reference"

    # 2) Larger (still small) batch, deliberately not a multiple of 128, so the
    #    Pallas path runs with a ragged last grid block and >=2 grid steps.
    B_big = 8195
    x_big = jax.random.normal(k_x2, (B_big, 1), dtype=jnp.float32)
    out_big = jax.block_until_ready(toy_model_forward(x_big, w1, b1, w2, b2))
    assert out_big.shape == (B_big, 1)
    assert jnp.allclose(out_big, ref_fn(x_big), atol=1e-5, rtol=1e-5), \
        "pallas-path mismatch vs reference"

    print("KERNEL_OK")
</pallas_src>

<mosaic_0001>
module attributes {stable_mosaic.version = 11 : i64} {
  func.func @_affine_kernel(%arg0: i32, %arg1: memref<2xf32, #tpu.memory_space<smem>>, %arg2: memref<32x128xf32, #tpu.memory_space<vmem>>, %arg3: memref<32x128xf32, #tpu.memory_space<vmem>>) attributes {dimension_semantics = [#tpu.dimension_semantics<parallel>], iteration_bounds = array<i64: 3>, scalar_prefetch = 0 : i64, scratch_operands = 0 : i64, tpu.core_type = #tpu.core_type<tc>, window_params = [{transform_indices = @transform_0, window_bounds = array<i64: 2>}, {transform_indices = @transform_1, window_bounds = array<i64: 32, 128>}, {transform_indices = @transform_2, window_bounds = array<i64: 32, 128>}]} {
    %c0 = arith.constant 0 : index
    %0 = memref.load %arg1[%c0] : memref<2xf32, #tpu.memory_space<smem>>
    %c1 = arith.constant 1 : index
    %1 = memref.load %arg1[%c1] : memref<2xf32, #tpu.memory_space<smem>>
    %c0_0 = arith.constant 0 : index
    %c0_1 = arith.constant 0 : index
    %2 = vector.load %arg2[%c0_0, %c0_1] : memref<32x128xf32, #tpu.memory_space<vmem>>, vector<32x128xf32>
    %3 = vector.broadcast %0 : f32 to vector<32x128xf32>
    %4 = arith.mulf %2, %3 : vector<32x128xf32>
    %5 = vector.broadcast %1 : f32 to vector<32x128xf32>
    %6 = arith.addf %4, %5 : vector<32x128xf32>
    %c0_2 = arith.constant 0 : index
    %c0_3 = arith.constant 0 : index
    %7 = vector.load %arg3[%c0_2, %c0_3] : memref<32x128xf32, #tpu.memory_space<vmem>>, vector<32x128xf32>
    tpu.vector_store %arg3[%c0_2, %c0_3], %6 {strides = array<i32>} : memref<32x128xf32, #tpu.memory_space<vmem>>, vector<32x128xf32>,
    return
  }
  func.func @transform_0(%arg0: i32) -> i32 {
    %c0_i32 = arith.constant 0 : i32
    %c0_i32_0 = arith.constant 0 : i32
    return %c0_i32 : i32
  }
  func.func @transform_1(%arg0: i32) -> (i32, i32) {
    %c0_i32 = arith.constant 0 : i32
    %c0_i32_0 = arith.constant 0 : i32
    return %arg0, %c0_i32 : i32, i32
  }
  func.func @transform_2(%arg0: i32) -> (i32, i32) {
    %c0_i32 = arith.constant 0 : i32
    %c0_i32_0 = arith.constant 0 : i32
    return %arg0, %c0_i32 : i32, i32
  }
}

</mosaic_0001>

<bundles_post_ra>
// kernel: tpu_custom_call.1
= control target key start
LH: loop header
LB: loop body
LE: loop exit
PB: predicated region body
PF: predicated region fallthrough
CT: control target
= control target key end

     0   :  { %7 = vsyncpa [#allocation5], 0  ;;  %s732_s0 = inlined_call_operand.hbm [shape: f32[2], index: 0, kind: input, shape index: {}]   ;;  %s733_s1 = inlined_call_operand.hbm [shape: f32[72,128], index: 1, kind: input, shape index: {}]   ;;  %s734_s2 = inlined_call_operand.hbm [shape: f32[72,128], index: 2, kind: output, shape index: {}]  }
   0x1   :  { %8 = vsyncpa [#allocation3], 0 }
   0x2   :  { %10 = vsyncpa [#allocation3 + $0x1], 0 }
   0x3   :  { %11 = vsyncpa [#allocation4], 0 }
   0x4   :  { %13 = vsyncpa [#allocation4 + $0x1], 0  ;;  %s531_s9 = smov 0   ;;  %s533_s10 = smov 0  }
   0x5   :  { %s535_s11 = smov 0   ;;  %s537_s12 = smov 0  }
   0x6 LB: > { %s552_s13 = sadd.s32 4294967295, %s507_s12   ;;  %s315_s14 = sadd.s32 4294967294, %s507_s12   ;;  %s507_s12 = sphi %s537_s12, %s748_s12   ;;  %s503_s11 = sphi %s535_s11, %s747_s11   ;;  %s499_s10 = sphi %s533_s10, %s746_s10   ;;  %s495_s9 = sphi %s531_s9, %s745_s9  }
   0x7   : > { %s556_s15 = sadd.s32 1, %s507_s12   ;;  %s47_s16 = sadd.s32 1, %s503_s11 }
   0x8   : > { %s44_s17 = ssub.s32 %s507_s12, %s556_s15  ;;  %p54_p0 = scmp.ne.s32.totalorder %s503_s11, %s499_s10 }
   0x9   : > { %p45_p1 = scmp.eq.s32.totalorder %s44_s17, 0  ;;  %p55_p2 = scmp.eq.s32.totalorder %s507_s12, 0 }
   0xa   : > { %p60_p3 = scmp.ne.s32.totalorder %s499_s10, %s495_s9  ;;  %p735_p4 = scmp.eq.s32.totalorder %s552_s13, 0 }
   0xb   : > { %s568_s18 = scalar_select %p45_p1, %s503_s11, %s47_s16  }
   0xc   : > { %p570_p5 = por %p55_p2, %p54_p0  ;;  %p576_p6 = por %p735_p4, %p60_p3 }
   0xd   : > { %p84_p7 = scmp.eq.s32.totalorder %s552_s13, 2  ;;  %p90_p8 = scmp.eq.s32.totalorder %s315_s14, 2 }
   0xe   : > { %p316_p9 = scmp.ge.s32.totalorder %s507_s12, 1  ;;  %p97_p10 = scmp.lt.s32.totalorder %s507_s12, 4 }
   0xf   : > { %p583_p11 = por %p84_p7, %p54_p0  ;;  %p587_p12 = por %p90_p8, %p60_p3 }
  0x10   : > { %p591_p13 = pnand %p316_p9, %p97_p10  ;;  %s396_s26 = scalar_lea.hbm %s732_s0, 16 }
  0x11   : > { %s738_s21 = scalar_select %p583_p11, 1, 0 }
  0x12   : > { %s739_s22 = scalar_select %p587_p12, 1, 0 }
  0x13   : > { %p348_p1 = pneg %p591_p13  ;;  %p397_p0 = scmp.ne.s32.totalorder %s732_s0, %s396_s26 }
  0x14   : > { %p403_p9 = scmp.lt.u32.totalorder %s396_s26, %s732_s0 }
  0x15   : > { %p349_p2 = pnand %p348_p1, %p735_p4 }
  0x17   : > { %p398_p3 = pneg %p349_p2 }
  0x19   : > { %p399_p7 = pnand %p398_p3, %p397_p0 }
  0x1b   : > { %p400_p8 = pneg %p399_p7 }
  0x1d   : > { %p405_p10 = pnand %p403_p9, %p400_p8 }
  0x1f   : > { %408 = shalt.err (!%p405_p10)
}
  0x20   : > { %s509_s3 = smov [#allocation2]   ;;  %p318_p1 = scmp.ge.s32.totalorder %s507_s12, 3 }
  0x21   : > { %351 = dma.hbm_to_smem (!%p349_p2), %s732_s0, 16, %s509_s3, [#allocation5]  }
  0x22   : > { %115 = sbr.rel (%p318_p1) target bundleno = 76 (0x4c), region = 20 }
  0x29   : > { %118 = sbr.rel (!%p570_p5) target bundleno = 76 (0x4c), region = 24  ;;  %s119_s6 = sand.u32 (%p570_p5), 1, %s503_s11  }
  0x2a   : > { %s320_s7 = sshll.u32 (%p570_p5), %s507_s12, 2  ;;  %s319_s8 = sshll.u32 (%p570_p5), %s119_s6, 5 }
  0x2b   : > { %s125_s14 = ssub.s32 (%p570_p5), 9, %s320_s7  ;;  %s619_s24 = scalar_lea.sflag (%p570_p5), [#allocation3], %s119_s6 }
  0x2c   : > { %p126_p0 = scmp.lt.s32.totalorder (%p570_p5), %s125_s14, 4  ;;  %s123_s25 = scalar_lea.vmem (%p570_p5), [#allocation6], %s319_s8 }
  0x30   : > { %s750_s14 = smov (!%p126_p0, %s125_s14), 4 }
  0x31   : > { %s616_s16 = sshll.u32 %s750_s14, 7 }
  0x32   : > { %s130_s17 = ssub.s32 512, %s616_s16 }
  0x33   : > { %131 = vsyncadd %s619_s24, %s130_s17  ;;  %p322_p5 = scmp.ne.s32.totalorder %s616_s16, 0  ;;  %s340_s19 = sshll.u32 %s507_s12, 9 }
  0x34   : > { %s627_s28 = scalar_lea.hbm %s733_s1, %s340_s19  ;;  %s136_s29 = sshll.u32 %s123_s25, 4  ;;  %s629_s29 = int_to_ptr.vmem [resolvable:$true] %s136_s29 }
  0x35   : > { %s409_s30 = scalar_lea.hbm %s627_s28, %s616_s16  ;;  %s413_s5 = scalar_lea.hbm %s733_s1, 1152 }
  0x36   : > { %p410_p2 = scmp.ne.s32.totalorder %s627_s28, %s409_s30  ;;  %p414_p8 = scmp.lt.u32.totalorder %s627_s28, %s733_s1 }
  0x37   : > { %p415_p9 = scmp.lt.u32.totalorder %s413_s5, %s409_s30  ;;  %p417_p1 = scmp.lt.u32.totalorder %s409_s30, %s627_s28 }
  0x38   : > { %p411_p3 = pnand %p410_p2, %p322_p5 }
  0x39   : > { %p416_p10 = por %p415_p9, %p414_p8 }
  0x3a   : > { %p412_p7 = pneg %p411_p3 }
  0x3b   : > { %p418_p0 = por %p417_p1, %p416_p10 }
  0x3d   : > { %p419_p4 = pnand %p418_p0, %p412_p7 }
  0x3f   : > { %422 = shalt.err (!%p419_p4)
}
  0x40   : > { %s423_s8 = scalar_lea.vmem %s629_s29, %s616_s16  ;;  %s510_s14 = smov [#allocation6]  }
  0x41   : > { %p424_p2 = scmp.ne.s32.totalorder %s629_s29, %s423_s8  ;;  %s427_s17 = sshll.u32 %s510_s14, 4  ;;  %s428_s17 = int_to_ptr.vmem [resolvable:$false] %s427_s17 }
  0x42   : > { %s429_s25 = scalar_lea.vmem %s428_s17, 1024  ;;  %p430_p11 = scmp.lt.s32.totalorder %s629_s29, %s428_s17 }
  0x43   : > { %p425_p3 = pnand %p424_p2, %p322_p5  ;;  %p431_p8 = scmp.lt.s32.totalorder %s429_s25, %s423_s8 }
  0x45   : > { %p426_p12 = pneg %p425_p3  ;;  %p432_p9 = por %p431_p8, %p430_p11 }
  0x47   : > { %p433_p10 = pnand %p432_p9, %p426_p12 }
  0x49   : > { %436 = shalt.err (!%p433_p10)
}
  0x4a   : > { %s511_s19 = smov 128   ;;  %s512_s26 = smov 8  }
  0x4b   : > { %142 = dma.hbm_to_vmem [thread:$0]  (%p322_p5), %s627_s28, %s616_s16, %s629_s29, %s619_s24, %s511_s19, %s511_s19, %s512_s26  }
  0x4c PF: > { %148 = sbr.rel (%p591_p13) target bundleno = 131 (0x83), region = 28  ;;  %p741_p4 = scmp.eq.s32.totalorder (!%p591_p13), %s552_s13, 0 }
  0x53   : > { %482 = dma.done.wait (%p741_p4), [#allocation5], 16   ;;  %p742_p11 = pmov %p741_p4 }
  0x54   : > { %s663_s27 = sand.u32 1, %s499_s10  }
  0x55   : > { %484 = vsyncadd (%p742_p11), [#allocation5], 4294967280  ;;  %s328_s30 = sshll.u32 %s663_s27, 5  ;;  %s155_s3 = scalar_lea.sflag [#allocation3], %s663_s27 }
  0x56   : > { %s158_s16 = scalar_lea.vmem [#allocation6], %s328_s30 }
  0x57   : > { %486 = dma.done.wait (%p576_p6), %s155_s3, 512  }
  0x58   : > { %488 = vsyncadd (%p576_p6), %s155_s3, 4294966784 }
  0x59   : > { %163 = sfence }
  0x5a   : > { %s190_s23 = sld [smem:[#allocation2]]  ;;  %s330_s24 = sld [smem:[#allocation2 + $0x1]]  ;;  %v192_v0 = vld [vmem:[%s158_s16] sm:$0xff]  ;;  %v193_v1 = vld [vmem:[%s158_s16 + $0x8] sm:$0xff]  ;;  %v194_v2 = vld [vmem:[%s158_s16 + $0x10] sm:$0xff] }
  0x5b   : > { %v195_v3 = vld [vmem:[%s158_s16 + $0x18] sm:$0xff]  ;;  %s179_s20 = scalar_lea.vmem [#allocation7], %s328_s30  ;;  %s211_s28 = scalar_lea.sflag [#allocation4], %s663_s27 }
  0x5c   : > { %p743_p6 = scmp.ne.s32.totalorder %s738_s21, 0 }
  0x5d   : > { %s332_s29 = sshll.u32 (%p743_p6), %s552_s13, 2 }
  0x5e   : > { %s219_s4 = ssub.s32 (%p743_p6), 9, %s332_s29 }
  0x5f   : > { %p220_p12 = scmp.lt.s32.totalorder (%p743_p6), %s219_s4, 4 }
  0x60   : > { %v196_v4 = vstv %s190_s23  ;;  %v201_v6 = vstv %s330_s24  ;;  %217 = sbr.rel (!%p743_p6) target bundleno = 131 (0x83), region = 40 }
  0x61   : > { %v197_v5 = vmul.f32 %v196_v4, %v192_v0  ;;  %v198_v7 = vmul.f32 %v196_v4, %v193_v1  ;;  %v199_v8 = vmul.f32 %v196_v4, %v194_v2  ;;  %v200_v9 = vmul.f32 %v196_v4, %v195_v3 }
  0x63   : > { %v202_v10 = vadd.f32 %v201_v6, %v197_v5  ;;  %v203_v11 = vadd.f32 %v201_v6, %v198_v7  ;;  %v204_v12 = vadd.f32 %v201_v6, %v199_v8  ;;  %v205_v13 = vadd.f32 %v201_v6, %v200_v9 }
  0x65   : > { %206 = vst [vmem:[%s179_s20] sm:$0xff] %v202_v10  ;;  %207 = vst [vmem:[%s179_s20 + $0x8] sm:$0xff] %v203_v11 }
  0x66   : > { %208 = vst [vmem:[%s179_s20 + $0x10] sm:$0xff] %v204_v12  ;;  %209 = vst [vmem:[%s179_s20 + $0x18] sm:$0xff] %v205_v13 }
  0x67   : > { %s752_s4 = smov (!%p220_p12, %s219_s4), 4 }
  0x68   : > { %s675_s5 = sshll.u32 %s752_s4, 7 }
  0x69   : > { %s224_s6 = ssub.s32 512, %s675_s5 }
  0x6a   : > { %225 = vsyncadd %s211_s28, %s224_s6  ;;  %p334_p13 = scmp.ne.s32.totalorder %s675_s5, 0  ;;  %s341_s7 = sshll.u32 %s552_s13, 9 }
  0x6b   : > { %s685_s14 = scalar_lea.hbm %s734_s2, %s341_s7  ;;  %s230_s17 = sshll.u32 %s179_s20, 4  ;;  %s687_s17 = int_to_ptr.vmem [resolvable:$true] %s230_s17 }
  0x6c   : > { %s437_s25 = scalar_lea.vmem %s687_s17, %s675_s5  ;;  %s513_s19 = smov [#allocation7]  }
  0x6d   : > { %p438_p5 = scmp.ne.s32.totalorder %s687_s17, %s437_s25  ;;  %s441_s26 = sshll.u32 %s513_s19, 4  ;;  %s442_s26 = int_to_ptr.vmem [resolvable:$false] %s441_s26 }
  0x6e   : > { %s443_s13 = scalar_lea.vmem %s442_s26, 1024  ;;  %p444_p0 = scmp.lt.s32.totalorder %s687_s17, %s442_s26 }
  0x6f   : > { %p439_p7 = pnand %p438_p5, %p334_p13  ;;  %p445_p2 = scmp.lt.s32.totalorder %s443_s13, %s437_s25 }
  0x71   : > { %p440_p1 = pneg %p439_p7  ;;  %p446_p3 = por %p445_p2, %p444_p0 }
  0x73   : > { %p447_p8 = pnand %p446_p3, %p440_p1 }
  0x75   : > { %450 = shalt.err (!%p447_p8)
}
  0x76   : > { %s451_s30 = scalar_lea.hbm %s685_s14, %s675_s5  ;;  %s455_s23 = scalar_lea.hbm %s734_s2, 1152 }
  0x77   : > { %p452_p9 = scmp.ne.s32.totalorder %s685_s14, %s451_s30  ;;  %p456_p11 = scmp.lt.u32.totalorder %s685_s14, %s734_s2 }
  0x78   : > { %p457_p6 = scmp.lt.u32.totalorder %s455_s23, %s451_s30  ;;  %p459_p5 = scmp.lt.u32.totalorder %s451_s30, %s685_s14 }
  0x79   : > { %p453_p10 = pnand %p452_p9, %p334_p13 }
  0x7a   : > { %p458_p12 = por %p457_p6, %p456_p11 }
  0x7b   : > { %p454_p4 = pneg %p453_p10 }
  0x7c   : > { %p460_p7 = por %p459_p5, %p458_p12 }
  0x7e   : > { %p461_p1 = pnand %p460_p7, %p454_p4 }
  0x80   : > { %464 = shalt.err (!%p461_p1)
}
  0x81   : > { %s514_s29 = smov 128   ;;  %s515_s4 = smov 8  }
  0x82   : > { %236 = dma.vmem_to_hbm [thread:$0]  (%p334_p13), %s687_s17, %s675_s5, %s685_s14, %s211_s28, %s514_s29, %s514_s29, %s515_s4  }
  0x83 PF: > { %p358_p0 = scmp.ge.s32.totalorder %s507_s12, 2  ;;  %s245_s6 = sand.u32 1, %s495_s9  }
  0x84   : > { %p744_p2 = scmp.ne.s32.totalorder %s739_s22, 0  ;;  %s246_s7 = scalar_lea.sflag [#allocation4], %s245_s6 }
  0x86   : > { %p353_p3 = pnand %p358_p0, %p744_p2 }
  0x88   : > { %490 = dma.done.wait (!%p353_p3), %s246_s7, 512  }
  0x89   : > { %492 = vsyncadd (!%p353_p3), %s246_s7, 4294966784  ;;  %p16_p8 = scmp.ge.s32.totalorder %s556_s15, 5   ;;  %s745_s9 = smov %s499_s10 }
  0x8a   : > { %s746_s10 = smov %s503_s11  ;;  %s747_s11 = smov %s568_s18 }
  0x8b   : > { %s748_s12 = smov %s556_s15  ;;  %18 = sbr.rel (!%p16_p8) target bundleno = 6 (0x6), region = 78 }
  0x92   :  { %251 = vsyncpa [#allocation3], 1 }
  0x93   :  { %253 = vsyncpa [#allocation3 + $0x1], 1 }
  0x94   :  { %254 = vsyncpa [#allocation4], 1 }
  0x95   :  { %256 = vsyncpa [#allocation4 + $0x1], 1 }
  0x96   :  { %257 = vsyncpa [#allocation5], 1 }
  0x97   :  { %259 = vsyncpa [#allocation5 + $0x1], 1 }

</bundles_post_ra>
